<compile_context>
chip_gen: v7x
topology: tpu7x:2x2x1
jax: 0.10.0
libtpu: 0.0.40
codegen_flags: <defaults>
</compile_context>

<pallas_src>
import functools

import jax
import jax.numpy as jnp
import numpy as np
from jax.experimental import pallas as pl
from jax.experimental.pallas import tpu as pltpu


def _round_up(a, b):
    return (a + b - 1) // b * b


def _sine_layer_kernel(x_ref, w_ref, b_ref, o_ref):
    # x_ref: (tm, K_pad) bf16   w_ref: (K_pad, N_pad) bf16   b_ref: (1, N_pad) f32
    x = x_ref[...]
    w = w_ref[...]
    # bf16 x bf16 -> f32 accumulation on the MXU, no transpose in the hot loop.
    y = jnp.dot(x, w, preferred_element_type=jnp.float32)
    y = y + b_ref[...]                       # f32 epilogue (broadcast bias row)
    o_ref[...] = jnp.sin(y).astype(o_ref.dtype)


def sine_layer(x, weight, bias, omega_0=30.0, *, tm=512):
    """Pallas implementation of SineLayer.forward.

    x:      (N, in_features) float32
    weight: (out_features, in_features) float32   (PyTorch nn.Linear layout)
    bias:   (out_features,) float32
    """
    M, in_features = x.shape
    out_features, in_features_w = weight.shape
    assert in_features == in_features_w

    # ---- one-time wrapper-side prep (not part of the hot loop) --------------
    # Fold omega_0 into the parameters, pre-transpose the weight, pad to
    # lane/MXU friendly multiples of 128, and pick the batch tile.
    k_pad = _round_up(in_features, 128)
    n_pad = _round_up(out_features, 128)

    w_t = (omega_0 * weight).astype(jnp.float32).T            # (in, out)
    w_t = jnp.pad(w_t, ((0, k_pad - in_features), (0, n_pad - out_features)))
    w_t = w_t.astype(jnp.bfloat16)

    b_row = jnp.pad(omega_0 * bias.astype(jnp.float32),
                    (0, n_pad - out_features)).reshape(1, n_pad)

    tm_eff = int(min(tm, _round_up(max(M, 1), 8)))
    m_pad = _round_up(M, tm_eff)
    x_p = jnp.pad(x, ((0, m_pad - M), (0, k_pad - in_features)))
    x_p = x_p.astype(jnp.bfloat16)

    grid = (m_pad // tm_eff,)

    # VMEM budget (double-buffered streaming tiles + resident W/b); cap the
    # scoped limit at 64 MiB so the same kernel fits v7x's smaller VMEM.
    out_itemsize = jnp.dtype(x.dtype).itemsize
    vmem_estimate = (2 * tm_eff * k_pad * 2          # x tiles (bf16), 2 buffers
                     + 2 * tm_eff * n_pad * out_itemsize  # out tiles, 2 buffers
                     + k_pad * n_pad * 2             # resident weight (bf16)
                     + n_pad * 4)                    # resident bias (f32)
    vmem_limit = int(min(64 << 20, max(32 << 20, 2 * vmem_estimate)))

    return pl.pallas_call(
        _sine_layer_kernel,
        out_shape=jax.ShapeDtypeStruct((m_pad, n_pad), x.dtype),
        grid_spec=pltpu.PrefetchScalarGridSpec(
            num_scalar_prefetch=0,
            grid=grid,
            in_specs=[
                pl.BlockSpec((tm_eff, k_pad), lambda i: (i, 0)),   # x tile
                pl.BlockSpec((k_pad, n_pad), lambda i: (0, 0)),    # full W^T
                pl.BlockSpec((1, n_pad), lambda i: (0, 0)),        # bias row
            ],
            out_specs=pl.BlockSpec((tm_eff, n_pad), lambda i: (i, 0)),
        ),
        compiler_params=pltpu.CompilerParams(
            dimension_semantics=("parallel",),
            vmem_limit_bytes=vmem_limit,
        ),
    )(x_p, w_t, b_row)[:M, :out_features]


def init_sine_layer_params(key, in_features, out_features, *, is_first=False,
                           omega_0=30.0):
    """Deterministic parameter init matching SineLayer.__init__ / init_weights."""
    kw, kb = jax.random.split(key)
    if is_first:
        bound_w = 1.0 / in_features
    else:
        bound_w = np.sqrt(6.0 / in_features) / omega_0
    weight = jax.random.uniform(
        kw, (out_features, in_features), jnp.float32, -bound_w, bound_w)
    # bias keeps nn.Linear's default init: U(-1/sqrt(in), 1/sqrt(in))
    bound_b = 1.0 / np.sqrt(in_features)
    bias = jax.random.uniform(kb, (out_features,), jnp.float32, -bound_b, bound_b)
    return weight, bias


if __name__ == "__main__":
    key = jax.random.PRNGKey(0)
    k_x, k_p = jax.random.split(key)

    # Small shapes consistent with the module: a batch of coordinate vectors.
    N, in_features, out_features = 16, 32, 64
    omega_0 = 30.0

    x = jax.random.normal(k_x, (N, in_features), jnp.float32)
    weight, bias = init_sine_layer_params(
        k_p, in_features, out_features, is_first=False, omega_0=omega_0)

    out = sine_layer(x, weight, bias, omega_0=omega_0, tm=512)
    out = jax.block_until_ready(out)
    assert out.shape == (N, out_features)

    # Reference check in plain JAX (same math as the PyTorch forward).
    # bf16 MXU inputs -> relaxed absolute tolerance vs. the f32 reference.
    ref_f32 = jnp.sin(omega_0 * (x @ weight.T + bias))
    np.testing.assert_allclose(np.asarray(out), np.asarray(ref_f32), atol=5e-2)

    # Tight check against a reference that uses the same bf16-rounded operands.
    x_b = x.astype(jnp.bfloat16).astype(jnp.float32)
    w_b = (omega_0 * weight).astype(jnp.bfloat16).astype(jnp.float32)
    ref_bf16 = jnp.sin(x_b @ w_b.T + omega_0 * bias)
    np.testing.assert_allclose(np.asarray(out), np.asarray(ref_bf16),
                               rtol=1e-4, atol=1e-4)

    print("KERNEL_OK")
</pallas_src>

<mosaic_0001>
module attributes {stable_mosaic.version = 11 : i64} {
  func.func @_sine_layer_kernel(%arg0: i32, %arg1: memref<16x128xbf16, #tpu.memory_space<vmem>>, %arg2: memref<128x128xbf16, #tpu.memory_space<vmem>>, %arg3: memref<1x128xf32, #tpu.memory_space<vmem>>, %arg4: memref<16x128xf32, #tpu.memory_space<vmem>>) attributes {dimension_semantics = [#tpu.dimension_semantics<parallel>], iteration_bounds = array<i64: 1>, scalar_prefetch = 0 : i64, scratch_operands = 0 : i64, tpu.core_type = #tpu.core_type<tc>, window_params = [{transform_indices = @transform_0, window_bounds = array<i64: 16, 128>}, {pipeline_mode = #tpu.pipeline_mode<synchronous>, transform_indices = @transform_1, window_bounds = array<i64: 128, 128>}, {pipeline_mode = #tpu.pipeline_mode<synchronous>, transform_indices = @transform_2, window_bounds = array<i64: 1, 128>}, {transform_indices = @transform_3, window_bounds = array<i64: 16, 128>}]} {
    %c0 = arith.constant 0 : index
    %c0_0 = arith.constant 0 : index
    %0 = vector.load %arg1[%c0, %c0_0] : memref<16x128xbf16, #tpu.memory_space<vmem>>, vector<16x128xbf16>
    %c0_1 = arith.constant 0 : index
    %c0_2 = arith.constant 0 : index
    %1 = vector.load %arg2[%c0_1, %c0_2] : memref<128x128xbf16, #tpu.memory_space<vmem>>, vector<128x128xbf16>
    %cst = arith.constant dense<0.000000e+00> : vector<16x128xf32>
    %2 = tpu.matmul %0, %1, %cst {dimension_numbers = #tpu.dot_dimension_numbers<[1], [0], [0], [1], [0, 0, 1, 1], [], []>} : vector<16x128xbf16>, vector<128x128xbf16>, vector<16x128xf32> -> vector<16x128xf32>
    %c0_3 = arith.constant 0 : index
    %c0_4 = arith.constant 0 : index
    %3 = vector.load %arg3[%c0_3, %c0_4] : memref<1x128xf32, #tpu.memory_space<vmem>>, vector<1x128xf32>
    %4 = vector.broadcast %3 : vector<1x128xf32> to vector<16x128xf32>
    %5 = arith.addf %2, %4 : vector<16x128xf32>
    %6 = math.sin %5 : vector<16x128xf32>
    %c0_5 = arith.constant 0 : index
    %c0_6 = arith.constant 0 : index
    %7 = vector.load %arg4[%c0_5, %c0_6] : memref<16x128xf32, #tpu.memory_space<vmem>>, vector<16x128xf32>
    tpu.vector_store %arg4[%c0_5, %c0_6], %6 {strides = array<i32>} : memref<16x128xf32, #tpu.memory_space<vmem>>, vector<16x128xf32>,
    return
  }
  func.func @transform_0(%arg0: i32) -> (i32, i32) {
    %c0_i32 = arith.constant 0 : i32
    %c0_i32_0 = arith.constant 0 : i32
    return %arg0, %c0_i32 : i32, i32
  }
  func.func @transform_1(%arg0: i32) -> (i32, i32) {
    %c0_i32 = arith.constant 0 : i32
    %c0_i32_0 = arith.constant 0 : i32
    %c0_i32_1 = arith.constant 0 : i32
    return %c0_i32, %c0_i32_0 : i32, i32
  }
  func.func @transform_2(%arg0: i32) -> (i32, i32) {
    %c0_i32 = arith.constant 0 : i32
    %c0_i32_0 = arith.constant 0 : i32
    %c0_i32_1 = arith.constant 0 : i32
    return %c0_i32, %c0_i32_0 : i32, i32
  }
  func.func @transform_3(%arg0: i32) -> (i32, i32) {
    %c0_i32 = arith.constant 0 : i32
    %c0_i32_0 = arith.constant 0 : i32
    return %arg0, %c0_i32 : i32, i32
  }
}

</mosaic_0001>

<bundles_post_ra>
// kernel: tpu_custom_call.1
= control target key start
LH: loop header
LB: loop body
LE: loop exit
PB: predicated region body
PF: predicated region fallthrough
CT: control target
= control target key end

     0   :  { %8 = vsyncpa [#allocation3], 0  ;;  %s686_s0 = inlined_call_operand.hbm [shape: bf16[16,128], index: 0, kind: input, shape index: {}]   ;;  %s687_s1 = inlined_call_operand.hbm [shape: bf16[128,128], index: 1, kind: input, shape index: {}]   ;;  %s688_s2 = inlined_call_operand.vmem [shape: f32[1,128], index: 2, kind: input, shape index: {}]   ;;  %s689_s3 = inlined_call_operand.hbm [shape: f32[16,128], index: 3, kind: output, shape index: {}]  }
   0x1   :  { %9 = vsyncpa [#allocation6], 0 }
   0x2   :  { %10 = vsyncpa [#allocation4], 0  ;;  %s551_s12 = smov [#allocation2]   ;;  %s479_s16 = scalar_lea.hbm %s686_s0, 128 }
   0x3   :  { %s16_s13 = sshll.u32 %s551_s12, 4  ;;  %p480_p0 = scmp.ne.s32.totalorder %s686_s0, %s479_s16  ;;  %s17_s13 = int_to_ptr.vmem [resolvable:$true] %s16_s13 }
   0x4   :  { %p483_p1 = scmp.lt.u32.totalorder %s479_s16, %s686_s0 }
   0x6   :  { %p485_p2 = pnand %p483_p1, %p480_p0 }
   0x8   :  { %488 = shalt.err (!%p485_p2)
}
   0x9   :  { %s489_s21 = scalar_lea.vmem %s17_s13, 128  ;;  %p494_p4 = scmp.lt.s32.totalorder %s17_s13, %s17_s13 }
   0xa   :  { %p490_p3 = scmp.ne.s32.totalorder %s17_s13, %s489_s21  ;;  %p495_p5 = scmp.lt.s32.totalorder %s489_s21, %s489_s21 }
   0xc   :  { %p496_p6 = por %p495_p5, %p494_p4 }
   0xe   :  { %p497_p7 = pnand %p496_p6, %p490_p3 }
  0x10   :  { %500 = shalt.err (!%p497_p7)
}
  0x11   :  { %s552_s22 = smov 64   ;;  %s553_s23 = smov 4  }
  0x12   :  { %22 = dma.hbm_to_vmem [thread:$0]  %s686_s0, 128, %s17_s13, [#allocation3], %s552_s22, %s552_s22, %s553_s23  }
  0x13   :  { %s554_s26 = smov [#allocation5]   ;;  %s501_s30 = scalar_lea.hbm %s687_s1, 1024 }
  0x14   :  { %s28_s27 = sshll.u32 %s554_s26, 4  ;;  %p502_p8 = scmp.ne.s32.totalorder %s687_s1, %s501_s30  ;;  %s29_s27 = int_to_ptr.vmem [resolvable:$true] %s28_s27 }
  0x15   :  { %p505_p9 = scmp.lt.u32.totalorder %s501_s30, %s687_s1 }
  0x17   :  { %p507_p10 = pnand %p505_p9, %p502_p8 }
  0x19   :  { %510 = shalt.err (!%p507_p10)
}
  0x1a   :  { %s511_s8 = scalar_lea.vmem %s29_s27, 1024  ;;  %p516_p12 = scmp.lt.s32.totalorder %s29_s27, %s29_s27 }
  0x1b   :  { %p512_p11 = scmp.ne.s32.totalorder %s29_s27, %s511_s8  ;;  %p517_p13 = scmp.lt.s32.totalorder %s511_s8, %s511_s8 }
  0x1d   :  { %p518_p0 = por %p517_p13, %p516_p12 }
  0x1f   :  { %p519_p1 = pnand %p518_p0, %p512_p11 }
  0x21   :  { %522 = shalt.err (!%p519_p1)
}
  0x22   :  { %34 = dma.hbm_to_vmem [thread:$0]  %s687_s1, 1024, %s29_s27, [#allocation6], %s552_s22, %s552_s22, %s553_s23  }
  0x23   :  { %545 = dma.done.wait [#allocation3], 128  }
  0x24   :  { %546 = vsyncadd [#allocation3], 4294967168 }
  0x25   :  { %547 = dma.done.wait [#allocation6], 1024  }
  0x26   :  { %548 = vsyncadd [#allocation6], 4294966272  ;;  %v555_v0 = vmov 0.0   ;;  %vm556_vm0 = vmmov 0   ;;  %v462_v1 = vld [vmem:[#allocation5] sm:$0xff]   ;;  %v463_v2 = vld [vmem:[#allocation5 + $0x8] sm:$0xff]  }
  0x27   :  { %419 = vmatprep.subr.bf16.mxu0 %v555_v0  ;;  %435 = vmatprep.mubr.msk.bf16.mxu0 %vm556_vm0, %v555_v0  ;;  %v464_v3 = vld [vmem:[#allocation5 + $0x10] sm:$0xff]   ;;  %v465_v4 = vld [vmem:[#allocation5 + $0x18] sm:$0xff]   ;;  %v466_v5 = vld [vmem:[#allocation5 + $0x20] sm:$0xff]   ;;  %v557_v35 = vmov 683565275  }
  0x28   :  { %420 = vmatpush3.bf16.msra.mxu0 %v462_v1  ;;  %v467_v6 = vld [vmem:[#allocation5 + $0x28] sm:$0xff]   ;;  %v468_v7 = vld [vmem:[#allocation5 + $0x30] sm:$0xff]   ;;  %v469_v8 = vld [vmem:[#allocation5 + $0x38] sm:$0xff]   ;;  %v558_v38 = vmov 2475754826  }
  0x29   :  { %421 = vmatprep.subr.bf16.mxu0 %v555_v0  ;;  %v470_v9 = vld [vmem:[#allocation2] sm:$0xff]   ;;  %v559_v40 = vmov 2131351028   ;;  %v560_v42 = vmov 2102212464  }
  0x2a   :  { %v392_v10 = vld [vmem:[%s688_s2] ss:$0 sm:$0xff]  ;;  %v561_v44 = vmov 920167782   ;;  %v562_v51 = vmov 1326507024  }
  0x2b   :  { %s563_s2 = smov [#allocation7]  }
  0x2c   :  { %422 = vmatpush3.bf16.msra.mxu0 %v463_v2  ;;  %s379_s11 = sshll.u32 %s563_s2, 4  ;;  %s380_s11 = int_to_ptr.vmem [resolvable:$true] %s379_s11 }
  0x2d   :  { %423 = vmatprep.subr.bf16.mxu0 %v555_v0  ;;  %s523_s12 = scalar_lea.vmem %s380_s11, 256  ;;  %p528_p3 = scmp.lt.s32.totalorder %s380_s11, %s380_s11 }
  0x2e   :  { %p524_p2 = scmp.ne.s32.totalorder %s380_s11, %s523_s12  ;;  %p529_p4 = scmp.lt.s32.totalorder %s523_s12, %s523_s12 }
  0x30   :  { %424 = vmatpush3.bf16.msra.mxu0 %v464_v3  ;;  %p530_p5 = por %p529_p4, %p528_p3 }
  0x31   :  { %425 = vmatprep.subr.bf16.mxu0 %v555_v0 }
  0x32   :  { %p531_p6 = pnand %p530_p5, %p524_p2 }
  0x34   :  { %426 = vmatpush3.bf16.msra.mxu0 %v465_v4 }
  0x35   :  { %427 = vmatprep.subr.bf16.mxu0 %v555_v0 }
  0x38   :  { %428 = vmatpush3.bf16.msra.mxu0 %v466_v5 }
  0x39   :  { %429 = vmatprep.subr.bf16.mxu0 %v555_v0 }
  0x3c   :  { %430 = vmatpush3.bf16.msra.mxu0 %v467_v6 }
  0x3d   :  { %431 = vmatprep.subr.bf16.mxu0 %v555_v0 }
  0x40   :  { %432 = vmatpush3.bf16.msra.mxu0 %v468_v7 }
  0x41   :  { %433 = vmatprep.subr.bf16.mxu0 %v555_v0 }
  0x44   :  { %434 = vmatpush3.bf16.msra.mxu0 %v469_v8 }
  0x47   :  { %436 = vmatmul.mubr.bf16.vlgmr.msra.gmra.mrb[0].mxu0 %v470_v9 }
 0x11a   :  { %v157_v11 = vpop.f32.mrb[0].mxu0 }
 0x11b   :  { %v613_v12 = vadd.f32 %v392_v10, %v157_v11  ;;  %v437_v13 = vpop.f32.mrb[1].mxu0 }
 0x11c   :  { %v160_v14 = vpop.f32.mrb[2].mxu0 }
 0x11d   :  { %v164_v15 = vand.u32 2147483647, %v613_v12  ;;  %v167_v16 = vand.u32 2139095040, %v613_v12  ;;  %v617_v17 = vadd.f32 %v392_v10, %v160_v14  ;;  %v438_v18 = vpop.f32.mrb[3].mxu0  ;;  %vm166_vm0 = vcmp.lt.s32.totalorder %v613_v12, 0 }
 0x11f   :  { %v168_v19 = vshrl.u32 %v167_v16, 23  ;;  %v171_v20 = vand.u32 8388607, %v164_v15  ;;  %v271_v21 = vand.u32 2139095040, %v617_v17  ;;  %v268_v23 = vand.u32 2147483647, %v617_v17 }
 0x120   :  { %vm165_vm15 = vcmp.le.f32.partialorder %v164_v15, 0.7853982 }
 0x121   :  { %v402_v22 = vadd.s32 4294967169, %v168_v19  ;;  %v272_v24 = vshrl.u32 %v271_v21, 23  ;;  %v172_v26 = vor.u32 8388608, %v171_v20  ;;  %v275_v28 = vand.u32 8388607, %v268_v23 }
 0x123   :  { %v174_v25 = vadd.s32 1, %v402_v22  ;;  %v406_v27 = vadd.s32 4294967169, %v272_v24  ;;  %v625_v33 = vshll.u32 %v172_v26, 8  ;;  %v276_v37 = vor.u32 8388608, %v275_v28 }
 0x125   :  { %vm175_vm1 = vcmp.gt.s32.totalorder %v174_v25, 0  ;;  %v278_v30 = vadd.s32 1, %v406_v27  ;;  %v316_v6 = vshll.u32 %v276_v37, 8 }
 0x126   :  { %v176_v29 = vsel %vm175_vm1, %v174_v25, 0  ;;  %vm270_vm1 = vcmp.lt.s32.totalorder %v617_v17, 0 }
 0x127   :  { %v177_v31 = vshrl.u32 %v176_v29, 5  ;;  %v178_v32 = vand.u32 31, %v176_v29  ;;  %vm279_vm2 = vcmp.gt.s32.totalorder %v278_v30, 0 }
 0x128   :  { %v280_v56 = vsel %vm279_vm2, %v278_v30, 0  ;;  %vm269_vm2 = vcmp.le.f32.partialorder %v268_v23, 0.7853982 }
 0x129   :  { %v179_v34 = vsub.s32 32, %v178_v32  ;;  %v181_v36 = vshll.u32 %v557_v35, %v178_v32  ;;  %v184_v39 = vshll.u32 %v558_v38, %v178_v32  ;;  %v187_v41 = vshll.u32 %v559_v40, %v178_v32 }
 0x12a   :  { %v190_v43 = vshll.u32 %v560_v42, %v178_v32  ;;  %v193_v45 = vshll.u32 %v561_v44, %v178_v32  ;;  %vm196_vm3 = vcmp.lt.s32.totalorder %v177_v31, 1  ;;  %vm198_vm4 = vcmp.lt.s32.totalorder %v177_v31, 3 }
 0x12b   :  { %v182_v46 = vshrl.u32 %v558_v38, %v179_v34  ;;  %v185_v47 = vshrl.u32 %v559_v40, %v179_v34  ;;  %v188_v48 = vshrl.u32 %v560_v42, %v179_v34  ;;  %v180_v49 = vshrl.u32 %v557_v35, %v179_v34 }
 0x12c   :  { %v191_v50 = vshrl.u32 %v561_v44, %v179_v34  ;;  %v194_v52 = vshrl.u32 %v562_v51, %v179_v34  ;;  %vm199_vm5 = vcmp.lt.s32.totalorder %v177_v31, 4  ;;  %v282_v59 = vand.u32 31, %v280_v56 }
 0x12d   :  { %v183_v53 = vor.u32 %v182_v46, %v181_v36  ;;  %v186_v54 = vor.u32 %v185_v47, %v184_v39  ;;  %v189_v55 = vor.u32 %v188_v48, %v187_v41  ;;  %vm197_vm6 = vcmp.lt.s32.totalorder %v177_v31, 2 }
 0x12e   :  { %v192_v57 = vor.u32 %v191_v50, %v190_v43  ;;  %v195_v58 = vor.u32 %v194_v52, %v193_v45  ;;  %v283_v3 = vsub.s32 32, %v282_v59  ;;  %v281_v10 = vshrl.u32 %v280_v56, 5 }
 0x12f   :  { %v200_v60 = vsel %vm196_vm3, %v180_v49, %v183_v53  ;;  %v201_v61 = vsel %vm199_vm5, %v189_v55, 2102212464  ;;  %v204_v62 = vsel %vm196_vm3, %v183_v53, %v186_v54  ;;  %v208_v63 = vsel %vm196_vm3, %v186_v54, %v189_v55 }
 0x130   :  { %v202_v0 = vsel %vm198_vm4, %v186_v54, %v201_v61  ;;  %v205_v1 = vsel %vm199_vm5, %v192_v57, 920167782  ;;  %v209_v2 = vsel %vm199_vm5, %v195_v58, 1326507024  ;;  %v285_v18 = vshll.u32 %v557_v35, %v282_v59 }
 0x131   :  { %v206_v4 = vsel %vm198_vm4, %v189_v55, %v205_v1  ;;  %v210_v5 = vsel %vm198_vm4, %v192_v57, %v209_v2  ;;  %v203_v7 = vsel %vm197_vm6, %v200_v60, %v202_v0  ;;  %v286_v19 = vshrl.u32 %v558_v38, %v283_v3 }
 0x132   :  { %v207_v8 = vsel %vm197_vm6, %v204_v62, %v206_v4  ;;  %v211_v9 = vsel %vm197_vm6, %v208_v63, %v210_v5  ;;  %v288_v20 = vshll.u32 %v558_v38, %v282_v59  ;;  %v289_v21 = vshrl.u32 %v559_v40, %v283_v3 }
 0x133   :  { %v637_v11 = vmul.u32.u64.low %v625_v33, %v211_v9  ;;  %v638_v13 = vmul.u32.u64.high %v625_v33, %v211_v9, %v637_v11  ;;  %v641_v14 = vmul.u32.u64.low %v625_v33, %v207_v8  ;;  %v642_v16 = vmul.u32.u64.high %v625_v33, %v207_v8, %v641_v14 }
 0x134   :  { %v291_v22 = vshll.u32 %v559_v40, %v282_v59  ;;  %v292_v24 = vshrl.u32 %v560_v42, %v283_v3  ;;  %v294_v25 = vshll.u32 %v560_v42, %v282_v59  ;;  %v295_v26 = vshrl.u32 %v561_v44, %v283_v3 }
 0x135   :  { %v287_v27 = vor.u32 %v286_v19, %v285_v18  ;;  %v290_v28 = vor.u32 %v289_v21, %v288_v20  ;;  %v297_v29 = vshll.u32 %v561_v44, %v282_v59  ;;  %v298_v30 = vshrl.u32 %v562_v51, %v283_v3 }
 0x136   :  { %v219_v31 = vmul.u32 %v625_v33, %v203_v7  ;;  %vm221_vm7 = vc.u32 %v638_v13, %v641_v14  ;;  %v222_v32 = vadd.s32 1, %v642_v16  ;;  %v293_v34 = vor.u32 %v292_v24, %v291_v22 }
 0x137   :  { %v284_v36 = vshrl.u32 %v557_v35, %v283_v3  ;;  %v296_v37 = vor.u32 %v295_v26, %v294_v25  ;;  %v299_v38 = vor.u32 %v298_v30, %v297_v29  ;;  %vm300_vm8 = vcmp.lt.s32.totalorder %v281_v10, 1 }
 0x138   :  { %v223_v39 = vsel %vm221_vm7, %v222_v32, %v642_v16  ;;  %vm302_vm9 = vcmp.lt.s32.totalorder %v281_v10, 3  ;;  %vm303_vm10 = vcmp.lt.s32.totalorder %v281_v10, 4  ;;  %v308_v40 = vsel %vm300_vm8, %v287_v27, %v290_v28 }
 0x139   :  { %v224_v41 = vadd.s32 %v223_v39, %v219_v31  ;;  %v305_v42 = vsel %vm303_vm10, %v293_v34, 2102212464  ;;  %v309_v43 = vsel %vm303_vm10, %v296_v37, 920167782  ;;  %v312_v33 = vsel %vm300_vm8, %v290_v28, %v293_v34 }
 0x13a   :  { %vm301_vm11 = vcmp.lt.s32.totalorder %v281_v10, 2  ;;  %v304_v44 = vsel %vm300_vm8, %v284_v36, %v287_v27  ;;  %v310_v45 = vsel %vm302_vm9, %v293_v34, %v309_v43  ;;  %v313_v46 = vsel %vm303_vm10, %v299_v38, 1326507024 }
 0x13b   :  { %v225_v47 = vadd.s32 536870912, %v224_v41  ;;  %v306_v48 = vsel %vm302_vm9, %v290_v28, %v305_v42  ;;  %v311_v49 = vsel %vm301_vm11, %v308_v40, %v310_v45  ;;  %v314_v35 = vsel %vm302_vm9, %v296_v37, %v313_v46 }
 0x13c   :  { %v315_v50 = vsel %vm301_vm11, %v312_v33, %v314_v35  ;;  %v652_v51 = vmul.u32.u64.low %v316_v6, %v311_v49  ;;  %v653_v52 = vmul.u32.u64.high %v316_v6, %v311_v49, %v652_v51  ;;  %v307_v56 = vsel %vm301_vm11, %v304_v44, %v306_v48 }
 0x13d   :  { %v226_v53 = vshrl.u32 %v225_v47, 30  ;;  %v655_v54 = vmul.u32.u64.low %v316_v6, %v315_v50  ;;  %v656_v55 = vmul.u32.u64.high %v316_v6, %v315_v50, %v655_v54  ;;  %v323_v60 = vmul.u32 %v316_v6, %v307_v56 }
 0x13e   :  { %v326_v58 = vadd.s32 1, %v653_v52  ;;  %v220_v9 = vadd.s32 %v641_v14, %v638_v13  ;;  %vm256_vm6 = vweird.f32 %v613_v12  ;;  %vm360_vm10 = vweird.f32 %v617_v17 }
 0x13f   :  { %v227_v57 = vshll.u32 %v226_v53, 30  ;;  %vm325_vm12 = vc.u32 %v656_v55, %v652_v51  ;;  %v250_v29 = vsub.s32 4, %v226_v53  ;;  %v324_v13 = vadd.s32 %v652_v51, %v656_v55 }
 0x140   :  { %v327_v61 = vsel %vm325_vm12, %v326_v58, %v653_v52 }
 0x141   :  { %v228_v59 = vsub.s32 %v224_v41, %v227_v57  ;;  %v328_v63 = vadd.s32 %v327_v61, %v323_v60  ;;  %v251_v40 = vsel %vm166_vm0, %v250_v29, %v226_v53 }
 0x142   :  { %v253_v44 = vsel %vm165_vm15, 0, %v251_v40 }
 0x143   :  { %v230_v62 = vsub.s32 0, %v228_v59  ;;  %v329_v1 = vadd.s32 536870912, %v328_v63  ;;  %v257_v47 = vadd.s32 3, %v253_v44 }
 0x145   :  { %v403_v0 = vmin.u32 %v230_v62, %v228_v59  ;;  %v330_v3 = vshrl.u32 %v329_v1, 30  ;;  %v258_v15 = vand.u32 3, %v257_v47 }
 0x147   :  { %v232_v2 = vclz %v403_v0  ;;  %v331_v5 = vshll.u32 %v330_v3, 30  ;;  %v354_v49 = vsub.s32 4, %v330_v3  ;;  %vm263_vm3 = vcmp.eq.s32.totalorder %v258_v15, 2 }
 0x148   :  { %vm260_vm4 = vcmp.eq.s32.totalorder %v258_v15, 0  ;;  %vm259_vm5 = vcmp.lt.s32.totalorder %v258_v15, 2 }
 0x149   :  { %v404_v4 = vadd.s32 4294967294, %v232_v2  ;;  %v332_v7 = vsub.s32 %v328_v63, %v331_v5  ;;  %v355_v51 = vsel %vm270_vm1, %v354_v49, %v330_v3 }
 0x14a   :  { %v357_v55 = vsel %vm269_vm2, 0, %v355_v51 }
 0x14b   :  { %vm405_vm13 = vcmp.lt.s32.totalorder %v404_v4, 0  ;;  %v334_v11 = vsub.s32 0, %v332_v7 }
 0x14c   :  { %v235_v8 = vsel %vm405_vm13, 0, %v404_v4 }
 0x14d   :  { %v236_v10 = vsub.s32 32, %v235_v8  ;;  %v240_v6 = vsub.s32 4294967266, %v235_v8  ;;  %v237_v16 = vshll.u32 %v228_v59, %v235_v8  ;;  %v407_v20 = vmin.u32 %v334_v11, %v332_v7 }
 0x14e   :  { %v361_v59 = vadd.s32 3, %v357_v55 }
 0x14f   :  { %v238_v18 = vshrl.u32 %v220_v9, %v236_v10  ;;  %v241_v19 = vadd.s32 127, %v240_v6  ;;  %v336_v24 = vclz %v407_v20 }
 0x150   :  { %v362_v62 = vand.u32 3, %v361_v59 }
 0x151   :  { %v239_v21 = vor.u32 %v238_v18, %v237_v16  ;;  %v242_v22 = vshll.u32 %v241_v19, 23  ;;  %v408_v26 = vadd.s32 4294967294, %v336_v24 }
 0x152   :  { %vm367_vm7 = vcmp.eq.s32.totalorder %v362_v62, 2  ;;  %vm364_vm8 = vcmp.eq.s32.totalorder %v362_v62, 0  ;;  %vm363_vm9 = vcmp.lt.s32.totalorder %v362_v62, 2 }
 0x153   :  { %v243_v25 = vor.u32 4788187, %v242_v22  ;;  %v246_v28 = vcvt.s32.f32 %v239_v21  ;;  %vm409_vm14 = vcmp.lt.s32.totalorder %v408_v26, 0 }
 0x154   :  { %v339_v30 = vsel %vm409_vm14, 0, %v408_v26 }
 0x155   :  { %v244_v27 = vand.u32 2147483647, %v243_v25  ;;  %v340_v14 = vsub.s32 32, %v339_v30  ;;  %v344_v32 = vsub.s32 4294967266, %v339_v30  ;;  %v341_v36 = vshll.u32 %v332_v7, %v339_v30 }
 0x157   :  { %v247_v31 = vmul.f32 %v246_v28, %v244_v27  ;;  %v342_v37 = vshrl.u32 %v324_v13, %v340_v14  ;;  %v345_v38 = vadd.s32 127, %v344_v32 }
 0x159   :  { %v248_v34 = vxor.u32 2147483648, %v247_v31  ;;  %v343_v41 = vor.u32 %v342_v37, %v341_v36  ;;  %v346_v42 = vshll.u32 %v345_v38, 23 }
 0x15b   :  { %v249_v39 = vsel %vm166_vm0, %v248_v34, %v247_v31  ;;  %v347_v33 = vor.u32 4788187, %v346_v42  ;;  %v350_v46 = vcvt.s32.f32 %v343_v41 }
 0x15c   :  { %v252_v43 = vsel %vm165_vm15, %v613_v12, %v249_v39 }
 0x15d   :  { %471 = vcosq.f32 %v252_v43  ;;  %v348_v45 = vand.u32 2147483647, %v347_v33 }
 0x15e   :  { %473 = vsinq.f32 %v252_v43 }
 0x15f   :  { %v351_v48 = vmul.f32 %v350_v46, %v348_v45 }
 0x161   :  { %v352_v35 = vxor.u32 2147483648, %v351_v48 }
 0x163   :  { %v353_v50 = vsel %vm270_vm1, %v352_v35, %v351_v48 }
 0x164   :  { %v356_v52 = vsel %vm269_vm2, %v617_v17, %v353_v50 }
 0x165   :  { %475 = vcosq.f32 %v356_v52 }
 0x166   :  { %477 = vsinq.f32 %v356_v52 }
 0x167   :  { %v472_v53 = vpop.eup %471 }
 0x168   :  { %v474_v54 = vpop.eup %473  ;;  %v264_v56 = vxor.u32 2147483648, %v472_v53 }
 0x169   :  { %v261_v57 = vxor.u32 2147483648, %v474_v54 }
 0x16a   :  { %v265_v58 = vsel %vm263_vm3, %v264_v56, %v474_v54 }
 0x16b   :  { %v262_v60 = vsel %vm260_vm4, %v472_v53, %v261_v57 }
 0x16c   :  { %v266_v23 = vsel %vm259_vm5, %v262_v60, %v265_v58 }
 0x16d   :  { %v267_v61 = vsel %vm256_vm6, nan, %v266_v23 }
 0x16e   :  { %372 = vst [vmem:[#allocation7] sm:$0xff] %v267_v61 }
 0x16f   :  { %v476_v63 = vpop.eup %475 }
 0x170   :  { %v478_v0 = vpop.eup %477  ;;  %v368_v1 = vxor.u32 2147483648, %v476_v63 }
 0x171   :  { %v365_v2 = vxor.u32 2147483648, %v478_v0 }
 0x172   :  { %v369_v3 = vsel %vm367_vm7, %v368_v1, %v478_v0 }
 0x173   :  { %v366_v4 = vsel %vm364_vm8, %v476_v63, %v365_v2 }
 0x174   :  { %v370_v5 = vsel %vm363_vm9, %v366_v4, %v369_v3 }
 0x175   :  { %v371_v12 = vsel %vm360_vm10, nan, %v370_v5 }
 0x176   :  { %373 = vst [vmem:[#allocation7 + $0x8] sm:$0xff] %v371_v12 }
 0x177   :  { %534 = shalt.err (!%p531_p6)
}
 0x178   :  { %s535_s15 = scalar_lea.hbm %s689_s3, 256 }
 0x179   :  { %p536_p7 = scmp.ne.s32.totalorder %s689_s3, %s535_s15  ;;  %p539_p8 = scmp.lt.u32.totalorder %s535_s15, %s689_s3 }
 0x17b   :  { %p541_p9 = pnand %p539_p8, %p536_p7 }
 0x17d   :  { %544 = shalt.err (!%p541_p9)
}
 0x17e   :  { %s564_s20 = smov 128   ;;  %s565_s21 = smov 8  }
 0x17f   :  { %385 = dma.vmem_to_hbm [thread:$0]  %s380_s11, 256, %s689_s3, [#allocation4], %s564_s20, %s564_s20, %s565_s21  }
 0x180   :  { %549 = dma.done.wait [#allocation4], 256  }
 0x181   :  { %550 = vsyncadd [#allocation4], 4294967040 }
 0x182   :  { %389 = vsyncpa [#allocation3], 1 }
 0x183   :  { %390 = vsyncpa [#allocation6], 1 }
 0x184   :  { %391 = vsyncpa [#allocation4], 1 }

</bundles_post_ra>
